<compile_context>
chip_gen: v6e
topology: v6e:2x2x1
jax: 0.10.0
libtpu: 0.0.40
codegen_flags: <defaults>
</compile_context>

<pallas_src>
import functools

import jax
import jax.numpy as jnp
from jax import lax
from jax.experimental import pallas as pl
from jax.experimental.pallas import tpu as pltpu


_MAX_INFLIGHT = 16  # row DMAs in flight per grid step (== DMA semaphores used)


def _gather_kernel(idx_ref, x_hbm, o_ref, sems, *, nsem):
    # idx_ref: SMEM (B, K) int32 -- token indices to keep (incl. cls slot)
    # x_hbm  : HBM  (B, N, D)    -- all tokens; memory_space=pl.ANY (no auto DMA)
    # o_ref  : VMEM (K, D)       -- gathered tokens for this batch (pipelined out)
    # sems   : DMA semaphore ring (nsem,)
    b = pl.program_id(0)
    k_keep = o_ref.shape[0]

    def row_copy(k, slot):
        row = idx_ref[b, k]
        return pltpu.make_async_copy(
            x_hbm.at[b, pl.ds(row, 1), :],   # (1, D) kept row in HBM
            o_ref.at[pl.ds(k, 1), :],        # (1, D) row of the output block
            sems.at[slot])

    def slot_of(k):
        return lax.rem(k, nsem)

    # Prime: put up to `nsem` row DMAs in flight.
    @pl.loop(0, nsem)
    def _prime(k):
        row_copy(k, slot_of(k)).start()

    # Steady state: retire the copy occupying this slot, then reuse the slot.
    if k_keep > nsem:
        @pl.loop(nsem, k_keep)
        def _steady(k):
            row_copy(k - nsem, slot_of(k - nsem)).wait()
            row_copy(k, slot_of(k)).start()

    # Drain the last `nsem` copies so the output block is fully written before
    # Pallas' pipelined writeback of this block runs.
    @pl.loop(k_keep - nsem, k_keep)
    def _drain(k):
        row_copy(k, slot_of(k)).wait()


def gather_tokens(x, idx):
    """out[b, k, :] = x[b, idx[b, k], :] via a scalar-prefetched DMA gather."""
    B, N, D = x.shape
    K = idx.shape[1]
    idx = idx.astype(jnp.int32)

    nsem = max(1, min(_MAX_INFLIGHT, K))

    # Only the double-buffered (K, D) output block is VMEM-resident; x never
    # enters VMEM except for the K gathered rows.  Override the scoped limit
    # only when needed (smallest default is v5e's 16 MiB), with ~1.2x headroom
    # and a hard cap well below v7x's 64 MiB per-core capacity.
    out_blk_bytes = 2 * K * D * x.dtype.itemsize
    if out_blk_bytes < (12 << 20):
        vmem_limit = None
    else:
        vmem_limit = int(min(out_blk_bytes * 12 // 10 + (1 << 20), 48 << 20))

    return pl.pallas_call(
        functools.partial(_gather_kernel, nsem=nsem),
        out_shape=jax.ShapeDtypeStruct((B, K, D), x.dtype),
        grid_spec=pltpu.PrefetchScalarGridSpec(
            num_scalar_prefetch=1,                      # idx -> SMEM up front
            grid=(B,),
            in_specs=[pl.BlockSpec(memory_space=pl.ANY)],   # x stays in HBM
            out_specs=pl.BlockSpec((pl.Squeezed(), K, D),
                                   lambda b, idx_ref: (b, 0, 0)),
            scratch_shapes=[pltpu.SemaphoreType.DMA((nsem,))],
        ),
        compiler_params=pltpu.CompilerParams(
            dimension_semantics=("parallel",),   # batch shards across TCs on v7x
            vmem_limit_bytes=vmem_limit),
    )(idx, x)


def patch_dropout(x, key, prob, exclude_first_token=True):
    """Functional equivalent of PatchDropout.forward (randomness from `key`)."""
    assert 0 <= prob < 1.0
    B, n_total, _ = x.shape

    num_tokens = n_total - 1 if exclude_first_token else n_total
    keep_prob = 1.0 - prob
    num_patches_keep = max(1, int(num_tokens * keep_prob))

    # torch.randn(batch, num_tokens) -> topk indices (descending by value),
    # same ordering semantics as jax.lax.top_k.
    rand = jax.random.normal(key, (B, num_tokens), dtype=jnp.float32)
    _, patch_indices_keep = lax.top_k(rand, num_patches_keep)
    patch_indices_keep = patch_indices_keep.astype(jnp.int32)

    if exclude_first_token:
        # Keep the cls token (index 0) first, then the kept patches shifted by
        # +1 into the full token axis -- equivalent to the split + cat in the
        # PyTorch module.
        idx_full = jnp.concatenate(
            [jnp.zeros((B, 1), jnp.int32), patch_indices_keep + 1], axis=1)
    else:
        idx_full = patch_indices_keep

    return gather_tokens(x, idx_full), idx_full


if __name__ == "__main__":
    key = jax.random.PRNGKey(0)
    k_x, k_drop = jax.random.split(key)

    B, N, D = 2, 9, 128         # 1 cls token + 8 patch tokens, hidden=128 (lane-dense)
    prob = 0.5                  # keep max(1, int(8 * 0.5)) = 4 patches -> out (2, 5, 128)

    x = jax.random.normal(k_x, (B, N, D), dtype=jnp.float32)

    out, idx_full = patch_dropout(x, k_drop, prob, exclude_first_token=True)
    out = jax.block_until_ready(out)

    # Reference gather in plain JAX; the DMA gather must be bit-exact.
    ref = jnp.take_along_axis(x, idx_full[:, :, None], axis=1)
    assert out.shape == (B, 1 + max(1, int((N - 1) * (1 - prob))), D)
    assert bool(jnp.array_equal(out, ref)), "gather mismatch"

    print("KERNEL_OK")
</pallas_src>

<mosaic_0001>
module attributes {stable_mosaic.version = 11 : i64} {
  func.func @_gather_kernel(%arg0: i32, %arg1: memref<2x5xi32, #tpu.memory_space<smem>>, %arg2: memref<2x9x128xf32, #tpu.memory_space<any>>, %arg3: memref<1x5x128xf32, #tpu.memory_space<vmem>>, %arg4: memref<5x!tpu.dma_semaphore, #tpu.memory_space<semaphore_mem>>) attributes {dimension_semantics = [#tpu.dimension_semantics<parallel>], iteration_bounds = array<i64: 2>, scalar_prefetch = 1 : i64, scratch_operands = 1 : i64, tpu.core_type = #tpu.core_type<tc>, window_params = [{}, {transform_indices = @transform_1, window_bounds = array<i64: 1, 5, 128>}]} {
    %c0_i32 = arith.constant 0 : i32
    %c5_i32 = arith.constant 5 : i32
    %0 = arith.addi %c0_i32, %c5_i32 : i32
    %c1_i32 = arith.constant 1 : i32
    scf.for %arg5 = %c0_i32 to %0 step %c1_i32  : i32 {
      %c1_i32_5 = arith.constant 1 : i32
      %2 = arith.muli %arg5, %c1_i32_5 : i32
      %c0_i32_6 = arith.constant 0 : i32
      %3 = arith.addi %c0_i32_6, %2 : i32
      %c5_i32_7 = arith.constant 5 : i32
      %4 = arith.remsi %3, %c5_i32_7 : i32
      %5 = arith.index_cast %arg0 : i32 to index
      %6 = arith.index_cast %3 : i32 to index
      %7 = memref.load %arg1[%5, %6] : memref<2x5xi32, #tpu.memory_space<smem>>
      %c0_i32_8 = arith.constant 0 : i32
      %8 = tpu.memref_slice %arg2[%arg0, %7, %c0_i32_8] : memref<2x9x128xf32, #tpu.memory_space<any>> -> memref<1x1x128xf32, #tpu.memory_space<any>>
      %9 = tpu.memref_squeeze %8 : memref<1x1x128xf32, #tpu.memory_space<any>> -> memref<1x128xf32, #tpu.memory_space<any>>
      %c0_i32_9 = arith.constant 0 : i32
      %c0_i32_10 = arith.constant 0 : i32
      %10 = tpu.memref_slice %arg3[%c0_i32_9, %3, %c0_i32_10] : memref<1x5x128xf32, #tpu.memory_space<vmem>> -> memref<1x1x128xf32, #tpu.memory_space<vmem>>
      %11 = tpu.memref_squeeze %10 : memref<1x1x128xf32, #tpu.memory_space<vmem>> -> memref<1x128xf32, #tpu.memory_space<vmem>>
      %12 = tpu.memref_slice %arg4[%4] : memref<5x!tpu.dma_semaphore, #tpu.memory_space<semaphore_mem>> -> memref<1x!tpu.dma_semaphore, #tpu.memory_space<semaphore_mem>>
      %13 = tpu.memref_squeeze %12 : memref<1x!tpu.dma_semaphore, #tpu.memory_space<semaphore_mem>> -> memref<!tpu.dma_semaphore, #tpu.memory_space<semaphore_mem>>
      tpu.enqueue_dma source(%9 : memref<1x128xf32, #tpu.memory_space<any>>) target(%11 : memref<1x128xf32, #tpu.memory_space<vmem>>) target_semaphore(%13 : memref<!tpu.dma_semaphore, #tpu.memory_space<semaphore_mem>>)
    }
    %c5_i32_0 = arith.constant 5 : i32
    %c0_i32_1 = arith.constant 0 : i32
    %c5_i32_2 = arith.constant 5 : i32
    %1 = arith.addi %c0_i32_1, %c5_i32_2 : i32
    %c1_i32_3 = arith.constant 1 : i32
    scf.for %arg5 = %c0_i32_1 to %1 step %c1_i32_3  : i32 {
      %c1_i32_5 = arith.constant 1 : i32
      %2 = arith.muli %arg5, %c1_i32_5 : i32
      %c0_i32_6 = arith.constant 0 : i32
      %3 = arith.addi %c0_i32_6, %2 : i32
      %c5_i32_7 = arith.constant 5 : i32
      %4 = arith.remsi %3, %c5_i32_7 : i32
      %5 = arith.index_cast %arg0 : i32 to index
      %6 = arith.index_cast %3 : i32 to index
      %7 = memref.load %arg1[%5, %6] : memref<2x5xi32, #tpu.memory_space<smem>>
      %c0_i32_8 = arith.constant 0 : i32
      %8 = tpu.memref_slice %arg2[%arg0, %7, %c0_i32_8] : memref<2x9x128xf32, #tpu.memory_space<any>> -> memref<1x1x128xf32, #tpu.memory_space<any>>
      %9 = tpu.memref_squeeze %8 : memref<1x1x128xf32, #tpu.memory_space<any>> -> memref<1x128xf32, #tpu.memory_space<any>>
      %c0_i32_9 = arith.constant 0 : i32
      %c0_i32_10 = arith.constant 0 : i32
      %10 = tpu.memref_slice %arg3[%c0_i32_9, %3, %c0_i32_10] : memref<1x5x128xf32, #tpu.memory_space<vmem>> -> memref<1x1x128xf32, #tpu.memory_space<vmem>>
      %11 = tpu.memref_squeeze %10 : memref<1x1x128xf32, #tpu.memory_space<vmem>> -> memref<1x128xf32, #tpu.memory_space<vmem>>
      %12 = tpu.memref_slice %arg4[%4] : memref<5x!tpu.dma_semaphore, #tpu.memory_space<semaphore_mem>> -> memref<1x!tpu.dma_semaphore, #tpu.memory_space<semaphore_mem>>
      %13 = tpu.memref_squeeze %12 : memref<1x!tpu.dma_semaphore, #tpu.memory_space<semaphore_mem>> -> memref<!tpu.dma_semaphore, #tpu.memory_space<semaphore_mem>>
      tpu.wait_dma2 semaphore(%13 : memref<!tpu.dma_semaphore, #tpu.memory_space<semaphore_mem>>) src(%9 : memref<1x128xf32, #tpu.memory_space<any>>) dst(%11 : memref<1x128xf32, #tpu.memory_space<vmem>>)
    }
    %c5_i32_4 = arith.constant 5 : i32
    return
  }
  func.func @transform_1(%arg0: i32, %arg1: memref<2x5xi32, #tpu.memory_space<smem>>) -> (i32, i32, i32) {
    %c0_i32 = arith.constant 0 : i32
    %c0_i32_0 = arith.constant 0 : i32
    %c0_i32_1 = arith.constant 0 : i32
    return %arg0, %c0_i32, %c0_i32_0 : i32, i32, i32
  }
}

</mosaic_0001>

<bundles_post_ra>
// kernel: tpu_custom_call.1
= control target key start
LH: loop header
LB: loop body
LE: loop exit
PB: predicated region body
PF: predicated region fallthrough
CT: control target
= control target key end

     0   :  { %s372_s0 = inlined_call_operand.vmem [shape: s32[2,5], index: 0, kind: input, shape index: {}]   ;;  %s373_s1 = inlined_call_operand.vmem [shape: f32[2,9,128], index: 1, kind: input, shape index: {}]   ;;  %s374_s2 = inlined_call_operand.vmem [shape: f32[2,5,128], index: 2, kind: output, shape index: {}]  }
   0x1   :  { %s7_s11 = sshll.u32 %s372_s0, 4  ;;  %s8_s11 = int_to_ptr.vmem [resolvable:$true] %s7_s11 }
   0x2   :  { %s294_s12 = scalar_lea.vmem %s8_s11, 32  ;;  %p299_p1 = scmp.lt.s32.totalorder %s8_s11, %s8_s11 }
   0x3   :  { %p295_p0 = scmp.ne.s32.totalorder %s8_s11, %s294_s12  ;;  %p300_p2 = scmp.lt.s32.totalorder %s294_s12, %s294_s12 }
   0x5   :  { %p301_p3 = por %p300_p2, %p299_p1 }
   0x7   :  { %p302_p4 = pnand %p301_p3, %p295_p0 }
   0x9   :  { %305 = shalt.err (!%p302_p4)  }
   0xa   :  { %s334_s13 = smov [#allocation4]  }
   0xb   :  { %10 = dma.vmem_to_smem %s8_s11, 32, %s334_s13, [#allocation3] }
   0xc   :  { %318 = dma.done.wait [#allocation3], 32 }
   0xd   :  { %319 = vsyncadd [#allocation3], 4294967264 }
   0xe   :  { %12 = sfence }
   0xf   :  { %s353_s14 = smov 0  }
  0x10 LB: > { %p250_p5 = scmp.ge.s32.totalorder %s324_s14, 2  ;;  %s324_s14 = sphi %s353_s14, %s18_s14  }
  0x11   : > { %p50_p6 = scmp.lt.s32.totalorder (!%p250_p5), %s324_s14, 1  ;;  %s326_s19 = smov (!%p250_p5), 0  }
  0x12   : > { %43 = sbr.rel (%p250_p5) target bundleno = 74 (0x4a), region = 12 }
  0x17   : > { %s51_s0 = scalar_select %p50_p6, %s324_s14, 1 }
  0x19   : > { %s251_s15 = sshll.u32 %s51_s0, 3 }
  0x1a   : > { %s53_s18 = scalar_lea.vmem %s374_s2, %s251_s15 }
  0x1b LB: >> { %s61_s20 = ssub.s32 0, %s328_s19  ;;  %s67_s22 = sshra.s32 %s328_s19, 7  ;;  %s328_s19 = sphi %s326_s19, %s59_s19  }
  0x1c   : >> { %s252_s21 = smin.u32 %s328_s19, %s61_s20  ;;  %s69_s23 = sadd.s32 %s324_s14, %s67_s22 }
  0x1d   : >> { %290 = sdivrem.u32 %s252_s21, 5  ;;  %s253_s24 = sshll.u32 %s69_s23, 7 }
  0x1e   : >> { %s72_s25 = sand.u32 127, %s328_s19  ;;  %s254_s28 = sshll.u32 %s324_s14, 4 }
  0x1f   : >> { %s73_s26 = sadd.s32 %s253_s24, %s72_s25  ;;  %p60_p7 = scmp.lt.s32.totalorder %s328_s19, 0 }
  0x20   : >> { %s74_s27 = sld [smem:[#allocation4 + %s73_s26]]  ;;  %s78_s29 = scalar_lea.vmem %s53_s18, %s328_s19 }
  0x26   : >> { %s291_s30 = spop.drf %290  ;;  %s76_s3 = sadd.s32 %s254_s28, %s74_s27 }
  0x27   : >> { %s65_s4 = ssub.s32 0, %s291_s30  ;;  %s77_s7 = scalar_lea.vmem %s373_s1, %s76_s3 }
  0x28   : >> { %s376_s4 = smov (!%p60_p7, %s65_s4), %s291_s30  ;;  %v98_v0 = vld [vmem:[%s77_s7] sm:$0x1] }
  0x29   : >> { %99 = vst [vmem:[%s78_s29] sm:$0x1] %v98_v0  ;;  %s79_s8 = scalar_lea.sflag [#allocation2], %s376_s4 }
  0x2a   : >> { %125 = vsyncadd %s79_s8, 16  ;;  %s59_s19 = sadd.s32 1, %s328_s19  }
  0x2b   : >> { %p56_p8 = scmp.ge.s32.totalorder %s59_s19, 5  }
  0x2c   : > { %s330_s9 = smov (%p56_p8), 0  }
  0x2d   : > { %58 = sbr.rel (!%p56_p8) target bundleno = 27 (0x1b), region = 101 }
  0x32 LB: >> { %s133_s10 = ssub.s32 0, %s332_s9  ;;  %p132_p9 = scmp.lt.s32.totalorder %s332_s9, 0  ;;  %s332_s9 = sphi %s330_s9, %s131_s9  }
  0x33   : >> { %s255_s11 = smin.u32 %s332_s9, %s133_s10 }
  0x34   : >> { %292 = sdivrem.u32 %s255_s11, 5 }
  0x3d   : >> { %s293_s12 = spop.drf %292 }
  0x3e   : >> { %s137_s13 = ssub.s32 0, %s293_s12 }
  0x3f   : >> { %s378_s13 = smov (!%p132_p9, %s137_s13), %s293_s12 }
  0x40   : >> { %s147_s0 = scalar_lea.sflag [#allocation2], %s378_s13 }
  0x41   : >> { %320 = dma.done.wait %s147_s0, 16 }
  0x42   : >> { %321 = vsyncadd %s147_s0, 4294967280  ;;  %s131_s9 = sadd.s32 1, %s332_s9  }
  0x43   : >> { %p128_p10 = scmp.ge.s32.totalorder %s131_s9, 5  }
  0x45   : > { %130 = sbr.rel (!%p128_p10) target bundleno = 50 (0x32), region = 112 }
  0x4a PF: > { %s18_s14 = sadd.s32 1, %s324_s14  }
  0x4b   : > { %p15_p11 = scmp.ge.s32.totalorder %s18_s14, 3  }
  0x4d   :  { %17 = sbr.rel (!%p15_p11) target bundleno = 16 (0x10), region = 123 }
  0x52   :  { %170 = vsyncmov [#allocation2] }
  0x55   :  { %s171_s15 = vpop.sfrf %170 }
  0x56   :  { %p258_p12 = scmp.ne.s32.totalorder %s171_s15, 0 }
  0x58   :  { %175 = shalt.err (%p258_p12)  }
  0x59   :  { %177 = vsyncmov [#allocation2 + $0x1] }
  0x5c   :  { %s178_s16 = vpop.sfrf %177 }
  0x5d   :  { %p259_p13 = scmp.ne.s32.totalorder %s178_s16, 0 }
  0x5f   :  { %182 = shalt.err (%p259_p13)  }
  0x60   :  { %184 = vsyncmov [#allocation2 + $0x2] }
  0x63   :  { %s185_s17 = vpop.sfrf %184 }
  0x64   :  { %p260_p0 = scmp.ne.s32.totalorder %s185_s17, 0 }
  0x66   :  { %189 = shalt.err (%p260_p0)  }
  0x67   :  { %191 = vsyncmov [#allocation2 + $0x3] }
  0x6a   :  { %s192_s18 = vpop.sfrf %191 }
  0x6b   :  { %p261_p1 = scmp.ne.s32.totalorder %s192_s18, 0 }
  0x6d   :  { %196 = shalt.err (%p261_p1)  }
  0x6e   :  { %198 = vsyncmov [#allocation2 + $0x4] }
  0x71   :  { %s199_s19 = vpop.sfrf %198 }
  0x72   :  { %p262_p2 = scmp.ne.s32.totalorder %s199_s19, 0 }
  0x74   :  { %203 = shalt.err (%p262_p2)  }

</bundles_post_ra>
